<compile_context>
chip_gen: v7x
topology: tpu7x:2x2x1
jax: 0.10.0
libtpu: 0.0.40
codegen_flags: <defaults>
</compile_context>

<pallas_src>
import math

import numpy as np
import jax
import jax.numpy as jnp
from jax.experimental import pallas as pl
from jax.experimental.pallas import tpu as pltpu


def _k2m_matmul_kernel(k_ref, t_ref, o_ref):
    """k_ref: (TB, P) flattened kernels; t_ref: (P, P) = kron(M0..Mn-1)^T; o_ref: (TB, P)."""
    o_ref[...] = jnp.dot(
        k_ref[...], t_ref[...], preferred_element_type=jnp.float32
    ).astype(o_ref.dtype)


@jax.jit
def _k2m_forward_flat(k_flat, t_t):
    B, P = k_flat.shape
    # Single batch tile when small; otherwise 8-aligned row tiles (Pallas masks the ragged tail).
    TB = B if B <= 512 else 512
    grid = (pl.cdiv(B, TB),)
    return pl.pallas_call(
        _k2m_matmul_kernel,
        out_shape=jax.ShapeDtypeStruct((B, P), k_flat.dtype),
        grid_spec=pltpu.PrefetchScalarGridSpec(
            num_scalar_prefetch=0,
            grid=grid,
            in_specs=[
                pl.BlockSpec((TB, P), lambda i: (i, 0)),   # batch tile of kernels
                pl.BlockSpec((P, P), lambda i: (0, 0)),    # transform, same block every step
            ],
            out_specs=pl.BlockSpec((TB, P), lambda i: (i, 0)),
        ),
        compiler_params=pltpu.CompilerParams(
            dimension_semantics=("parallel",),
        ),
    )(k_flat, t_t)


class K2M:
    """JAX/Pallas port of K2M: convert convolution kernel(s) to moment matrices.

    Usage (mirrors the PyTorch module):
        k2m = K2M([5, 5])
        m = k2m(k)          # k has shape [..., 5, 5]
    """

    def __init__(self, shape):
        self._shape = tuple(int(l) for l in shape)
        self._dim = len(self._shape)
        assert self._dim > 0
        # Per-axis moment matrices (same as the _MK buffers).
        # TODO(synk): PyTorch builds/applies these in float64; TPU Pallas/MXU has no f64, so we run in f32.
        mats = []
        for l in self._shape:
            m = np.zeros((l, l), dtype=np.float64)
            for i in range(l):
                m[i] = (np.arange(l) - (l - 1) // 2) ** i / math.factorial(i)
            mats.append(m)
        self.M = [jnp.asarray(m, jnp.float32) for m in mats]
        self._mats_np = mats
        # Fused transform: out_flat = k_flat @ kron(M0,...,Mn-1)^T  (row-major flattening).
        t = mats[0]
        for m in mats[1:]:
            t = np.kron(t, m)
        self._t_t = jnp.asarray(t.T, jnp.float32)
        self._p = int(np.prod(self._shape))

    def size(self):
        return self._shape

    def dim(self):
        return self._dim

    def __call__(self, k):
        k = jnp.asarray(k, jnp.float32)
        assert k.ndim >= self._dim and tuple(k.shape[-self._dim:]) == self._shape
        orig_shape = k.shape
        k_flat = k.reshape(-1, self._p)            # _packdim (adds batch dim if needed)
        out_flat = _k2m_forward_flat(k_flat, self._t_t)
        return out_flat.reshape(orig_shape)


if __name__ == "__main__":
    key = jax.random.PRNGKey(0)

    # PhyDNet usage: K2M([7,7]) applied to the 49 PhyCell 7x7 conv filters at once.
    shape = (7, 7)
    n_filters = 49
    k2m = K2M(shape)

    k = jax.random.normal(key, (n_filters,) + shape, jnp.float32)
    m = k2m(k)
    jax.block_until_ready(m)

    # Reference: the original per-axis tensordot chain, evaluated in float64 on host.
    m0 = k2m._mats_np[0]
    m1 = k2m._mats_np[1]
    m_ref = np.einsum("sq,pr,bqr->bsp", m0, m1, np.asarray(k, np.float64))

    assert m.shape == k.shape
    assert bool(jnp.all(jnp.isfinite(m)))
    assert np.allclose(np.asarray(m, np.float64), m_ref, atol=1e-3, rtol=1e-3)

    # Docstring example: un-batched 5x5 kernel.
    k2m5 = K2M([5, 5])
    k5 = jax.random.normal(jax.random.fold_in(key, 1), (5, 5), jnp.float32)
    m5 = k2m5(k5)
    jax.block_until_ready(m5)
    m5_ref = np.einsum(
        "sq,pr,qr->sp", k2m5._mats_np[0], k2m5._mats_np[1], np.asarray(k5, np.float64)
    )
    assert np.allclose(np.asarray(m5, np.float64), m5_ref, atol=1e-3, rtol=1e-3)

    print("KERNEL_OK")
</pallas_src>

<mosaic_0001>
module attributes {stable_mosaic.version = 11 : i64} {
  func.func @_k2m_matmul_kernel(%arg0: i32, %arg1: memref<49x49xf32, #tpu.memory_space<vmem>>, %arg2: memref<49x49xf32, #tpu.memory_space<vmem>>, %arg3: memref<49x49xf32, #tpu.memory_space<vmem>>) attributes {dimension_semantics = [#tpu.dimension_semantics<parallel>], iteration_bounds = array<i64: 1>, scalar_prefetch = 0 : i64, scratch_operands = 0 : i64, tpu.core_type = #tpu.core_type<tc>, window_params = [{transform_indices = @transform_0, window_bounds = array<i64: 49, 49>}, {pipeline_mode = #tpu.pipeline_mode<synchronous>, transform_indices = @transform_1, window_bounds = array<i64: 49, 49>}, {transform_indices = @transform_2, window_bounds = array<i64: 49, 49>}]} {
    %c0 = arith.constant 0 : index
    %c0_0 = arith.constant 0 : index
    %0 = vector.load %arg1[%c0, %c0_0] : memref<49x49xf32, #tpu.memory_space<vmem>>, vector<49x49xf32>
    %c0_1 = arith.constant 0 : index
    %c0_2 = arith.constant 0 : index
    %1 = vector.load %arg2[%c0_1, %c0_2] : memref<49x49xf32, #tpu.memory_space<vmem>>, vector<49x49xf32>
    %cst = arith.constant dense<0.000000e+00> : vector<49x49xf32>
    %2 = tpu.matmul %0, %1, %cst {dimension_numbers = #tpu.dot_dimension_numbers<[1], [0], [0], [1], [0, 0, 1, 1], [], []>} : vector<49x49xf32>, vector<49x49xf32>, vector<49x49xf32> -> vector<49x49xf32>
    %c0_3 = arith.constant 0 : index
    %c0_4 = arith.constant 0 : index
    %3 = vector.load %arg3[%c0_3, %c0_4] : memref<49x49xf32, #tpu.memory_space<vmem>>, vector<49x49xf32>
    tpu.vector_store %arg3[%c0_3, %c0_4], %2 {strides = array<i32>} : memref<49x49xf32, #tpu.memory_space<vmem>>, vector<49x49xf32>,
    return
  }
  func.func @transform_0(%arg0: i32) -> (i32, i32) {
    %c0_i32 = arith.constant 0 : i32
    %c0_i32_0 = arith.constant 0 : i32
    return %arg0, %c0_i32 : i32, i32
  }
  func.func @transform_1(%arg0: i32) -> (i32, i32) {
    %c0_i32 = arith.constant 0 : i32
    %c0_i32_0 = arith.constant 0 : i32
    %c0_i32_1 = arith.constant 0 : i32
    return %c0_i32, %c0_i32_0 : i32, i32
  }
  func.func @transform_2(%arg0: i32) -> (i32, i32) {
    %c0_i32 = arith.constant 0 : i32
    %c0_i32_0 = arith.constant 0 : i32
    return %arg0, %c0_i32 : i32, i32
  }
}

</mosaic_0001>

<bundles_post_ra>
// kernel: _k2m_forward_flat.1
= control target key start
LH: loop header
LB: loop body
LE: loop exit
PB: predicated region body
PF: predicated region fallthrough
CT: control target
= control target key end

     0   :  { %7 = vsyncpa [#allocation3], 0  ;;  %s448_s0 = inlined_call_operand.hbm [shape: f32[49,49], index: 0, kind: input, shape index: {}]   ;;  %s449_s1 = inlined_call_operand.hbm [shape: f32[49,49], index: 1, kind: input, shape index: {}]   ;;  %s450_s2 = inlined_call_operand.hbm [shape: f32[49,49], index: 2, kind: output, shape index: {}]  }
   0x1   :  { %8 = vsyncpa [#allocation6], 0 }
   0x2   :  { %9 = vsyncpa [#allocation4], 0  ;;  %s360_s9 = smov [#allocation2]   ;;  %s288_s13 = scalar_lea.hbm %s448_s0, 896 }
   0x3   :  { %s15_s10 = sshll.u32 %s360_s9, 4  ;;  %p289_p0 = scmp.ne.s32.totalorder %s448_s0, %s288_s13  ;;  %s16_s10 = int_to_ptr.vmem [resolvable:$true] %s15_s10 }
   0x4   :  { %p292_p1 = scmp.lt.u32.totalorder %s288_s13, %s448_s0 }
   0x6   :  { %p294_p2 = pnand %p292_p1, %p289_p0 }
   0x8   :  { %297 = shalt.err (!%p294_p2)
}
   0x9   :  { %s298_s18 = scalar_lea.vmem %s16_s10, 896  ;;  %p303_p4 = scmp.lt.s32.totalorder %s16_s10, %s16_s10 }
   0xa   :  { %p299_p3 = scmp.ne.s32.totalorder %s16_s10, %s298_s18  ;;  %p304_p5 = scmp.lt.s32.totalorder %s298_s18, %s298_s18 }
   0xc   :  { %p305_p6 = por %p304_p5, %p303_p4 }
   0xe   :  { %p306_p7 = pnand %p305_p6, %p299_p3 }
  0x10   :  { %309 = shalt.err (!%p306_p7)
}
  0x11   :  { %s361_s19 = smov 128   ;;  %s362_s20 = smov 8  }
  0x12   :  { %21 = dma.hbm_to_vmem [thread:$0]  %s448_s0, 896, %s16_s10, [#allocation3], %s361_s19, %s361_s19, %s362_s20  }
  0x13   :  { %s363_s23 = smov [#allocation5]   ;;  %s310_s27 = scalar_lea.hbm %s449_s1, 896 }
  0x14   :  { %s27_s24 = sshll.u32 %s363_s23, 4  ;;  %p311_p8 = scmp.ne.s32.totalorder %s449_s1, %s310_s27  ;;  %s28_s24 = int_to_ptr.vmem [resolvable:$true] %s27_s24 }
  0x15   :  { %p314_p9 = scmp.lt.u32.totalorder %s310_s27, %s449_s1 }
  0x17   :  { %p316_p10 = pnand %p314_p9, %p311_p8 }
  0x19   :  { %319 = shalt.err (!%p316_p10)
}
  0x1a   :  { %s320_s4 = scalar_lea.vmem %s28_s24, 896  ;;  %p325_p12 = scmp.lt.s32.totalorder %s28_s24, %s28_s24 }
  0x1b   :  { %p321_p11 = scmp.ne.s32.totalorder %s28_s24, %s320_s4  ;;  %p326_p13 = scmp.lt.s32.totalorder %s320_s4, %s320_s4 }
  0x1d   :  { %p327_p0 = por %p326_p13, %p325_p12 }
  0x1f   :  { %p328_p1 = pnand %p327_p0, %p321_p11 }
  0x21   :  { %331 = shalt.err (!%p328_p1)
}
  0x22   :  { %33 = dma.hbm_to_vmem [thread:$0]  %s449_s1, 896, %s28_s24, [#allocation6], %s361_s19, %s361_s19, %s362_s20  }
  0x23   :  { %354 = dma.done.wait [#allocation3], 896  }
  0x24   :  { %355 = vsyncadd [#allocation3], 4294966400 }
  0x25   :  { %356 = dma.done.wait [#allocation6], 896  }
  0x26   :  { %357 = vsyncadd [#allocation6], 4294966400  ;;  %v364_v0 = vmov 0.0|0.0   ;;  %vm365_vm0 = vmmov 0   ;;  %v366_v1 = vmov 0.0   ;;  %v47_v2 = vld [vmem:[#allocation5] sm:$0xff] }
  0x27   :  { %263 = vmatprep.subr.bf16.mxu0 %v364_v0  ;;  %272 = vmatprep.subr.bf16.mxu1 %v364_v0  ;;  %v48_v3 = vld [vmem:[#allocation5 + $0x8] sm:$0xff]  ;;  %v49_v4 = vld [vmem:[#allocation5 + $0x10] sm:$0xff]  ;;  %v50_v6 = vld [vmem:[#allocation5 + $0x18] sm:$0xff]  ;;  %vm76_vm1 = vcmask 1040384   ;;  %vm54_vm2 = vcmask 400384   ;;  %vm186_vm3 = vcmask 393216  }
  0x28   :  { %242 = vmatprep.mubr.msk.f32.mxu0 %vm365_vm0, %v366_v1  ;;  %254 = vmatprep.mubr.msk.f32.mxu1 %vm365_vm0, %v366_v1  ;;  %v264_v5 = vpack.c.bf16 %v48_v3, %v47_v2  ;;  %v267_v7 = vpack.c.bf16 %v50_v6, %v49_v4  ;;  %v51_v8 = vld [vmem:[#allocation5 + $0x20] sm:$0xff]  ;;  %v52_v9 = vld [vmem:[#allocation5 + $0x28] sm:$0xff]  ;;  %v53_v11 = vld [vmem:[#allocation5 + $0x30] sm:$0x1]  ;;  %s367_s1 = smov [#allocation7]  }
  0x29   :  { %v270_v10 = vpack.c.bf16 %v52_v9, %v51_v8  ;;  %v40_v12 = vld [vmem:[#allocation2] sm:$0xff]  ;;  %v41_v14 = vld [vmem:[#allocation2 + $0x8] sm:$0xff]  ;;  %v42_v16 = vld [vmem:[#allocation2 + $0x10] sm:$0xff]  ;;  %s193_s6 = sshll.u32 %s367_s1, 4  ;;  %s194_s6 = int_to_ptr.vmem [resolvable:$true] %s193_s6 }
  0x2a   :  { %265 = vmatpush3.bf16.msra.mxu0 %v264_v5  ;;  %276 = vmatpush3.bf16.msra.mxu1 %v264_v5  ;;  %v44_v13 = vld [vmem:[#allocation2 + $0x20] sm:$0xff]  ;;  %v45_v15 = vld [vmem:[#allocation2 + $0x28] sm:$0xff]  ;;  %v46_v17 = vld [vmem:[#allocation2 + $0x30] sm:$0x1]  ;;  %s332_s7 = scalar_lea.vmem %s194_s6, 896  ;;  %p337_p3 = scmp.lt.s32.totalorder %s194_s6, %s194_s6 }
  0x2b   :  { %266 = vmatprep.subr.bf16.mxu0 %v364_v0  ;;  %273 = vmatprep.subr.bf16.mxu1 %v364_v0  ;;  %v43_v18 = vld [vmem:[#allocation2 + $0x18] sm:$0xff]  ;;  %p333_p2 = scmp.ne.s32.totalorder %s194_s6, %s332_s7  ;;  %p338_p4 = scmp.lt.s32.totalorder %s332_s7, %s332_s7 }
  0x2d   :  { %p339_p5 = por %p338_p4, %p337_p3 }
  0x2e   :  { %268 = vmatpush3.bf16.msra.mxu0 %v267_v7  ;;  %277 = vmatpush3.bf16.msra.mxu1 %v267_v7 }
  0x2f   :  { %269 = vmatprep.subr.bf16.mxu0 %v364_v0  ;;  %274 = vmatprep.subr.bf16.mxu1 %v364_v0  ;;  %p340_p6 = pnand %p339_p5, %p333_p2 }
  0x32   :  { %271 = vmatpush3.bf16.msra.mxu0 %v270_v10  ;;  %278 = vmatpush3.bf16.msra.mxu1 %v270_v10 }
  0x33   :  { %240 = vmatprep.subr.mxu0 %v366_v1  ;;  %275 = vmatprep.subr.mxu1 %v366_v1 }
  0x36   :  { %241 = vmatpush3.msk.msra.mxu0 %vm76_vm1, %v53_v11  ;;  %279 = vmatpush3.msk.msra.mxu1 %vm76_vm1, %v53_v11 }
  0x37   :  { %243 = vmatmul.mubr.msk.f32.vlgmr.msra.gmra.mrb[0].mxu0 %vm54_vm2, %v40_v12  ;;  %255 = vmatmul.mubr.msk.f32.vlgmr.msra.gmra.mrb[0].mxu1 %vm54_vm2, %v44_v13 }
  0x38   :  { %245 = vmatprep.mubr.msk.f32.mxu0 %vm365_vm0, %v366_v1  ;;  %257 = vmatprep.mubr.msk.f32.mxu1 %vm365_vm0, %v366_v1 }
  0x3b   :  { %246 = vmatmul.mubr.msk.f32.gmra.mrb[2].mxu0 %vm54_vm2, %v41_v14  ;;  %258 = vmatmul.mubr.msk.f32.gmra.mrb[2].mxu1 %vm54_vm2, %v45_v15 }
  0x3c   :  { %248 = vmatprep.mubr.msk.f32.mxu0 %vm365_vm0, %v366_v1  ;;  %260 = vmatprep.mubr.msk.f32.mxu1 %vm365_vm0, %v366_v1 }
  0x3f   :  { %249 = vmatmul.mubr.msk.f32.gmra.mrb[4].mxu0 %vm54_vm2, %v42_v16  ;;  %261 = vmatmul.mubr.msk.f32.gmra.mrb[4].mxu1 %vm54_vm2, %v46_v17 }
  0x40   :  { %251 = vmatprep.mubr.msk.f32.mxu0 %vm365_vm0, %v366_v1 }
  0x43   :  { %252 = vmatmul.mubr.msk.f32.gmra.mrb[6].mxu0 %vm54_vm2, %v43_v18 }
 0x10a   :  { %v146_v19 = vpop.f32.mrb[0].mxu0  ;;  %v166_v20 = vpop.f32.mrb[0].mxu1 }
 0x10b   :  { %180 = vst.msk [vmem:[#allocation7] sm:$0xff] %vm54_vm2, %v146_v19  ;;  %v244_v21 = vpop.f32.mrb[1].mxu0  ;;  %184 = vst.msk [vmem:[#allocation7 + $0x20] sm:$0xff] %vm54_vm2, %v166_v20  ;;  %v256_v22 = vpop.f32.mrb[1].mxu1 }
 0x10e   :  { %v151_v23 = vpop.f32.mrb[2].mxu0  ;;  %v171_v24 = vpop.f32.mrb[2].mxu1 }
 0x10f   :  { %181 = vst.msk [vmem:[#allocation7 + $0x8] sm:$0xff] %vm54_vm2, %v151_v23  ;;  %v247_v25 = vpop.f32.mrb[3].mxu0  ;;  %185 = vst.msk [vmem:[#allocation7 + $0x28] sm:$0xff] %vm54_vm2, %v171_v24  ;;  %v259_v26 = vpop.f32.mrb[3].mxu1 }
 0x112   :  { %v156_v27 = vpop.f32.mrb[4].mxu0  ;;  %v176_v28 = vpop.f32.mrb[4].mxu1 }
 0x113   :  { %182 = vst.msk [vmem:[#allocation7 + $0x10] sm:$0xff] %vm54_vm2, %v156_v27  ;;  %v250_v29 = vpop.f32.mrb[5].mxu0  ;;  %v262_v30 = vpop.f32.mrb[5].mxu1 }
 0x114   :  { %187 = vst.msk [vmem:[#allocation7 + $0x30] sm:$0x1] %vm186_vm3, %v176_v28 }
 0x116   :  { %v161_v31 = vpop.f32.mrb[6].mxu0 }
 0x117   :  { %183 = vst.msk [vmem:[#allocation7 + $0x18] sm:$0xff] %vm54_vm2, %v161_v31  ;;  %v253_v32 = vpop.f32.mrb[7].mxu0 }
 0x118   :  { %343 = shalt.err (!%p340_p6)
}
 0x119   :  { %s344_s10 = scalar_lea.hbm %s450_s2, 896 }
 0x11a   :  { %p345_p7 = scmp.ne.s32.totalorder %s450_s2, %s344_s10  ;;  %p348_p8 = scmp.lt.u32.totalorder %s344_s10, %s450_s2 }
 0x11c   :  { %p350_p9 = pnand %p348_p8, %p345_p7 }
 0x11e   :  { %353 = shalt.err (!%p350_p9)
}
 0x11f   :  { %199 = dma.vmem_to_hbm [thread:$0]  %s194_s6, 896, %s450_s2, [#allocation4], %s361_s19, %s361_s19, %s362_s20  }
 0x120   :  { %358 = dma.done.wait [#allocation4], 896  }
 0x121   :  { %359 = vsyncadd [#allocation4], 4294966400 }
 0x122   :  { %203 = vsyncpa [#allocation3], 1 }
 0x123   :  { %204 = vsyncpa [#allocation6], 1 }
 0x124   :  { %205 = vsyncpa [#allocation4], 1 }

</bundles_post_ra>
